<compile_context>
chip_gen: v6e
topology: v6e:2x2x1
jax: 0.10.0
libtpu: 0.0.40
codegen_flags: <defaults>
</compile_context>

<pallas_src>
import functools

import jax
import jax.numpy as jnp
import numpy as np
from jax.experimental import pallas as pl
from jax.experimental.pallas import tpu as pltpu

LANE = 128
SUBLANE = 8


# ----------------------------------------------------------------------------
# TPU-generation gating (tile size / megacore split)
# ----------------------------------------------------------------------------
def _device_kind():
    try:
        return jax.devices()[0].device_kind.lower()
    except Exception:
        return ""


def _max_tile_rows():
    # v5e: 16 MiB default scoped VMEM -> keep (2048,128) f32 blocks (update_omega
    # streams 5 operands x 2 pipeline buffers = ~10 MiB).
    # v6e/v7x: 32 MiB default scoped VMEM -> (4096,128) blocks (~20 MiB) halve the
    # ~0.35 us per-grid-step overhead share at 1.3-3.2 TB/s HBM.
    kind = _device_kind()
    if any(g in kind for g in ("v2", "v3", "v4", "v5")):
        return 2048
    return 4096


def _num_splits():
    # The 2-way "parallel" reduction split only helps on 2-TensorCore chips (v7x);
    # on single-TC v5e/v6e it is just extra padding + a duplicated epilogue.
    return 2 if "v7" in _device_kind() else 1


def _plan_layout(n_elems, max_tile_rows, want_splits):
    """Pick (tile_rows, splits, padded_rows) once per model / per chip generation."""
    rows_needed = max(1, -(-int(n_elems) // LANE))
    tile_rows = -(-rows_needed // SUBLANE) * SUBLANE          # small models: one tile
    tile_rows = int(min(max_tile_rows, max(tile_rows, SUBLANE)))
    natural_steps = -(-rows_needed // tile_rows)
    splits = int(min(want_splits, natural_steps))             # never split a 1-tile model
    steps_per_split = -(-natural_steps // splits)
    rows = splits * steps_per_split * tile_rows
    return tile_rows, splits, rows


# ----------------------------------------------------------------------------
# update_omega kernel: omega_new = omega + W * 1/((p - p_prev)^2 + epsilon)
# Pure HBM-bandwidth stream; one fused launch over all parameters; in-place omega.
# ----------------------------------------------------------------------------
def _update_omega_kernel(w_ref, p_ref, prev_ref, omega_ref, out_ref, *, epsilon):
    d = p_ref[...] - prev_ref[...]
    # Exact reciprocal (approx=False) preserves the 1e-5 tolerance while keeping the
    # long f32 divide sequence off the VALU slots.
    out_ref[...] = omega_ref[...] + w_ref[...] * pl.reciprocal(d * d + epsilon,
                                                               approx=False)


@functools.partial(jax.jit, static_argnames=("epsilon", "tile_rows"))
def update_omega_fused(w_pad, p_pad, prev_pad, omega_pad, *, epsilon, tile_rows):
    rows = w_pad.shape[0]
    spec = pl.BlockSpec((tile_rows, LANE), lambda i: (i, 0))
    return pl.pallas_call(
        functools.partial(_update_omega_kernel, epsilon=float(epsilon)),
        out_shape=jax.ShapeDtypeStruct((rows, LANE), jnp.float32),
        grid_spec=pltpu.PrefetchScalarGridSpec(
            num_scalar_prefetch=0,
            grid=(rows // tile_rows,),
            in_specs=[spec, spec, spec, spec],
            out_specs=spec,
        ),
        # omega (input index 3) is updated in place -> no extra HBM allocation/copy.
        input_output_aliases={3: 0},
        compiler_params=pltpu.CompilerParams(dimension_semantics=("parallel",)),
    )(w_pad, p_pad, prev_pad, omega_pad)


# ----------------------------------------------------------------------------
# surrogate_loss kernel: sum( omega * (p - prev)^2 ) over ALL parameters at once.
# Each step folds its (tile_rows, 128) contribution down to (8, 128) (free vector adds
# under the HBM-bound step) and accumulates into the resident (8, 128) output block —
# no multi-MiB scratch, 3 vld + no per-step 1 MiB accumulator read-modify-write.
# Zero-padding (p == prev == 0 there) guarantees padded elements contribute 0.
# ----------------------------------------------------------------------------
def _surrogate_loss_kernel(p_ref, prev_ref, omega_ref, out_ref, *, tile_rows):
    @pl.when(pl.program_id(1) == 0)
    def _():
        out_ref[...] = jnp.zeros_like(out_ref)

    d = p_ref[...] - prev_ref[...]
    contrib = omega_ref[...] * d * d                                   # (tile_rows, 128)
    # Regroup the major dim only (no lane/sublane relayout) and sum with vector adds.
    out_ref[...] += contrib.reshape(tile_rows // SUBLANE, SUBLANE, LANE).sum(axis=0)


@functools.partial(jax.jit, static_argnames=("tile_rows", "splits"))
def surrogate_loss_fused(p_pad, prev_pad, omega_pad, *, tile_rows, splits):
    rows = p_pad.shape[0]
    steps = rows // (tile_rows * splits)
    in_spec = pl.BlockSpec((tile_rows, LANE), lambda s, i: (s * steps + i, 0))
    out = pl.pallas_call(
        functools.partial(_surrogate_loss_kernel, tile_rows=tile_rows),
        out_shape=jax.ShapeDtypeStruct((splits * SUBLANE, LANE), jnp.float32),
        grid_spec=pltpu.PrefetchScalarGridSpec(
            num_scalar_prefetch=0,
            grid=(splits, steps),
            in_specs=[in_spec, in_spec, in_spec],
            out_specs=pl.BlockSpec((SUBLANE, LANE), lambda s, i: (s, 0)),
        ),
        compiler_params=pltpu.CompilerParams(
            dimension_semantics=("parallel", "arbitrary")),
    )(p_pad, prev_pad, omega_pad)
    # Tiny final fold of the per-core (8,128) partials; fused into this same jit.
    return jnp.sum(out)


# ----------------------------------------------------------------------------
# JAX port of helper/continual_learner.py::ContinualLearner
# SI state is kept permanently in the padded (rows, 128) layout so both SI ops are
# exactly one kernel launch each with no wrapper-side flatten/pad/slice passes.
# ----------------------------------------------------------------------------
class ContinualLearnerJAX:
    def __init__(self, params):
        self.params = dict(params)                      # name -> jnp array
        self._names = list(self.params.keys())          # fixed parameter order
        self._shapes = {n: tuple(self.params[n].shape) for n in self._names}
        sizes = [int(np.prod(self._shapes[n])) if self._shapes[n] else 1
                 for n in self._names]
        offs = np.cumsum([0] + sizes)
        self._offsets = {n: (int(offs[i]), int(offs[i + 1]))
                         for i, n in enumerate(self._names)}
        self._total = int(offs[-1])

        # Fixed padded layout chosen once per model / per TPU generation.
        self._tile_rows, self._splits, self._rows = _plan_layout(
            self._total, _max_tile_rows(), _num_splits())

        # Persistent padded SI buffers + fused padded view of the current params.
        self._params_pad = self._flatten_pad(self.params)
        self._prev_pad = None       # concatenated+padded SI_prev_task
        self._omega_pad = None      # concatenated+padded SI_omega

        # bookkeeping attributes mirrored from the PyTorch module
        self.mask_dict = None
        self.excit_buffer_list = []
        self.si_c = 0
        self.epsilon = 0.1
        self.ewc_lambda = 0
        self.gamma = 1.0
        self.online = True
        self.fisher_n = None
        self.emp_FI = False
        self.EWC_task_count = 0

    # --- layout helpers -------------------------------------------------------
    def _flatten_pad(self, by_name):
        flat = jnp.concatenate(
            [jnp.asarray(by_name[n], jnp.float32).reshape(-1) for n in self._names])
        flat = jnp.pad(flat, (0, self._rows * LANE - self._total))
        return flat.reshape(self._rows, LANE)

    def set_params(self, params):
        """Update the predictor parameters and their fused padded view."""
        self.params = dict(params)
        self._params_pad = self._flatten_pad(self.params)

    # --- module API -----------------------------------------------------------
    def forward(self, x):
        # TODO(synk): forward() is abstract in the PyTorch ContinualLearner;
        # subclasses supply the predictor, so there is nothing to lower here.
        raise NotImplementedError

    def register_prev_task(self):
        self._prev_pad = self._params_pad     # arrays are immutable: alias, no copy

    def update_omega(self, W, epsilon):
        w_pad = self._flatten_pad({n: W[n.replace('.', '__')] for n in self._names})
        omega_pad = (self._omega_pad if self._omega_pad is not None
                     else jnp.zeros((self._rows, LANE), jnp.float32))
        self._omega_pad = update_omega_fused(
            w_pad, self._params_pad, self._prev_pad, omega_pad,
            epsilon=float(epsilon), tile_rows=self._tile_rows)
        self._prev_pad = self._params_pad

    def surrogate_loss(self):
        if self._omega_pad is None:
            return jnp.float32(0.0)
        return surrogate_loss_fused(
            self._params_pad, self._prev_pad, self._omega_pad,
            tile_rows=self._tile_rows, splits=self._splits)

    # --- per-parameter views of the fused SI buffers ---------------------------
    def si_omega(self, name):
        s, e = self._offsets[name]
        return self._omega_pad.reshape(-1)[s:e].reshape(self._shapes[name])

    def si_prev(self, name):
        s, e = self._offsets[name]
        return self._prev_pad.reshape(-1)[s:e].reshape(self._shapes[name])


if __name__ == "__main__":
    key = jax.random.PRNGKey(0)
    k1, k2, k3, k4, k5, k6, k7 = jax.random.split(key, 7)

    # Small synthetic predictor parameters (deterministic init).
    params_prev = {
        "fc0.weight": jax.random.normal(k1, (128, 256), jnp.float32) * 0.05,
        "fc1.weight": jax.random.normal(k2, (32, 32), jnp.float32) * 0.1,
        "fc1.bias":   jax.random.normal(k3, (32,), jnp.float32) * 0.1,
        "fc2.weight": jax.random.normal(k4, (10, 32), jnp.float32) * 0.1,
        "fc2.bias":   jax.random.normal(k5, (10,), jnp.float32) * 0.1,
    }
    # Parameters after "training on a task" = prev + small delta.
    deltas = {n: jax.random.normal(jax.random.fold_in(k6, i), p.shape,
                                   jnp.float32) * 0.01
              for i, (n, p) in enumerate(params_prev.items())}
    params_cur = {n: params_prev[n] + deltas[n] for n in params_prev}
    # SI path-integral contributions W (positive, per-parameter).
    W = {n.replace('.', '__'):
         jnp.abs(jax.random.normal(jax.random.fold_in(k7, i), p.shape,
                                   jnp.float32))
         for i, (n, p) in enumerate(params_prev.items())}

    learner = ContinualLearnerJAX(params_prev)
    learner.register_prev_task()
    learner.set_params(params_cur)               # "after training" weights
    learner.update_omega(W, learner.epsilon)     # fused Pallas elementwise kernel

    # Move the weights a bit more and evaluate the surrogate loss.
    params_next = {n: params_cur[n] + 0.02 * deltas[n] for n in params_cur}
    learner.set_params(params_next)
    loss = learner.surrogate_loss()              # fused Pallas reduction kernel
    loss = jax.block_until_ready(loss)

    # Pure-JAX reference check.
    ref_loss = 0.0
    for n in params_prev:
        kn = n.replace('.', '__')
        p_change = params_cur[n] - params_prev[n]
        omega_ref = W[kn] / (p_change ** 2 + learner.epsilon)
        d = params_next[n] - params_cur[n]
        ref_loss = ref_loss + jnp.sum(omega_ref * d * d)
        np.testing.assert_allclose(np.asarray(learner.si_omega(n)),
                                   np.asarray(omega_ref), rtol=1e-5, atol=1e-5)
    np.testing.assert_allclose(np.asarray(loss), np.asarray(ref_loss),
                               rtol=1e-4, atol=1e-6)

    print("KERNEL_OK")
</pallas_src>

<mosaic_0001>
module attributes {stable_mosaic.version = 11 : i64} {
  func.func @_update_omega_kernel(%arg0: i32, %arg1: memref<272x128xf32, #tpu.memory_space<vmem>>, %arg2: memref<272x128xf32, #tpu.memory_space<vmem>>, %arg3: memref<272x128xf32, #tpu.memory_space<vmem>>, %arg4: memref<272x128xf32, #tpu.memory_space<vmem>>, %arg5: memref<272x128xf32, #tpu.memory_space<vmem>>) attributes {dimension_semantics = [#tpu.dimension_semantics<parallel>], iteration_bounds = array<i64: 1>, scalar_prefetch = 0 : i64, scratch_operands = 0 : i64, tpu.core_type = #tpu.core_type<tc>, window_params = [{transform_indices = @transform_0, window_bounds = array<i64: 272, 128>}, {transform_indices = @transform_1, window_bounds = array<i64: 272, 128>}, {transform_indices = @transform_2, window_bounds = array<i64: 272, 128>}, {transform_indices = @transform_3, window_bounds = array<i64: 272, 128>}, {transform_indices = @transform_4, window_bounds = array<i64: 272, 128>}]} {
    %c0 = arith.constant 0 : index
    %c0_0 = arith.constant 0 : index
    %0 = vector.load %arg2[%c0, %c0_0] : memref<272x128xf32, #tpu.memory_space<vmem>>, vector<272x128xf32>
    %c0_1 = arith.constant 0 : index
    %c0_2 = arith.constant 0 : index
    %1 = vector.load %arg3[%c0_1, %c0_2] : memref<272x128xf32, #tpu.memory_space<vmem>>, vector<272x128xf32>
    %2 = arith.subf %0, %1 : vector<272x128xf32>
    %c0_3 = arith.constant 0 : index
    %c0_4 = arith.constant 0 : index
    %3 = vector.load %arg4[%c0_3, %c0_4] : memref<272x128xf32, #tpu.memory_space<vmem>>, vector<272x128xf32>
    %c0_5 = arith.constant 0 : index
    %c0_6 = arith.constant 0 : index
    %4 = vector.load %arg1[%c0_5, %c0_6] : memref<272x128xf32, #tpu.memory_space<vmem>>, vector<272x128xf32>
    %5 = arith.mulf %2, %2 : vector<272x128xf32>
    %cst = arith.constant 1.000000e-01 : f32
    %6 = vector.broadcast %cst : f32 to vector<272x128xf32>
    %7 = arith.addf %5, %6 : vector<272x128xf32>
    %8 = tpu.reciprocal %7 : vector<272x128xf32> -> vector<272x128xf32>
    %9 = arith.mulf %4, %8 : vector<272x128xf32>
    %10 = arith.addf %3, %9 : vector<272x128xf32>
    %c0_7 = arith.constant 0 : index
    %c0_8 = arith.constant 0 : index
    %11 = vector.load %arg5[%c0_7, %c0_8] : memref<272x128xf32, #tpu.memory_space<vmem>>, vector<272x128xf32>
    tpu.vector_store %arg5[%c0_7, %c0_8], %10 {strides = array<i32>} : memref<272x128xf32, #tpu.memory_space<vmem>>, vector<272x128xf32>,
    return
  }
  func.func @transform_0(%arg0: i32) -> (i32, i32) {
    %c0_i32 = arith.constant 0 : i32
    %c0_i32_0 = arith.constant 0 : i32
    return %arg0, %c0_i32 : i32, i32
  }
  func.func @transform_1(%arg0: i32) -> (i32, i32) {
    %c0_i32 = arith.constant 0 : i32
    %c0_i32_0 = arith.constant 0 : i32
    return %arg0, %c0_i32 : i32, i32
  }
  func.func @transform_2(%arg0: i32) -> (i32, i32) {
    %c0_i32 = arith.constant 0 : i32
    %c0_i32_0 = arith.constant 0 : i32
    return %arg0, %c0_i32 : i32, i32
  }
  func.func @transform_3(%arg0: i32) -> (i32, i32) {
    %c0_i32 = arith.constant 0 : i32
    %c0_i32_0 = arith.constant 0 : i32
    return %arg0, %c0_i32 : i32, i32
  }
  func.func @transform_4(%arg0: i32) -> (i32, i32) {
    %c0_i32 = arith.constant 0 : i32
    %c0_i32_0 = arith.constant 0 : i32
    return %arg0, %c0_i32 : i32, i32
  }
}

</mosaic_0001>

<bundles_post_ra>
// kernel: update_omega_fused.1
= control target key start
LH: loop header
LB: loop body
LE: loop exit
PB: predicated region body
PF: predicated region fallthrough
CT: control target
= control target key end

     0   :  { %9 = vsyncpa [#allocation3], 0  ;;  %s829_s0 = inlined_call_operand.vmem [shape: f32[272,128], index: 0, kind: input, shape index: {}]   ;;  %s830_s1 = inlined_call_operand.vmem [shape: f32[272,128], index: 1, kind: input, shape index: {}]   ;;  %s831_s2 = inlined_call_operand.hbm [shape: f32[272,128], index: 2, kind: input, shape index: {}]   ;;  %s832_s3 = inlined_call_operand.hbm [shape: f32[272,128], index: 3, kind: input, shape index: {}, may-alias: {3,4}]   ;;  %s833_s4 = inlined_call_operand.hbm [shape: f32[272,128], index: 4, kind: output, shape index: {}, may-alias: {3,4}]  }
   0x1   :  { %10 = vsyncpa [#allocation6], 0 }
   0x2   :  { %11 = vsyncpa [#allocation4], 0  ;;  %s577_s15 = smov [#allocation2]  }
   0x3   :  { %s21_s16 = sshll.u32 %s577_s15, 4  ;;  %s22_s16 = int_to_ptr.vmem [resolvable:$true] %s21_s16 }
   0x4   :  { %s519_s17 = scalar_lea.vmem %s22_s16, 4352  ;;  %p524_p1 = scmp.lt.s32.totalorder %s22_s16, %s22_s16 }
   0x5   :  { %p520_p0 = scmp.ne.s32.totalorder %s22_s16, %s519_s17  ;;  %p525_p2 = scmp.lt.s32.totalorder %s519_s17, %s519_s17 }
   0x7   :  { %p526_p3 = por %p525_p2, %p524_p1 }
   0x9   :  { %p527_p4 = pnand %p526_p3, %p520_p0 }
   0xb   :  { %530 = shalt.err (!%p527_p4)
}
   0xc   :  { %s578_s18 = smov 128   ;;  %s579_s19 = smov 8  }
   0xd   :  { %27 = dma.hbm_to_vmem [thread:$0]  %s831_s2, 4352, %s22_s16, [#allocation3], %s578_s18, %s578_s18, %s579_s19  }
   0xe   :  { %s580_s22 = smov [#allocation5]  }
   0xf   :  { %s33_s23 = sshll.u32 %s580_s22, 4  ;;  %s34_s23 = int_to_ptr.vmem [resolvable:$true] %s33_s23 }
  0x10   :  { %s539_s24 = scalar_lea.vmem %s34_s23, 4352  ;;  %p544_p6 = scmp.lt.s32.totalorder %s34_s23, %s34_s23 }
  0x11   :  { %p540_p5 = scmp.ne.s32.totalorder %s34_s23, %s539_s24  ;;  %p545_p7 = scmp.lt.s32.totalorder %s539_s24, %s539_s24 }
  0x13   :  { %p546_p8 = por %p545_p7, %p544_p6 }
  0x15   :  { %p547_p9 = pnand %p546_p8, %p540_p5 }
  0x17   :  { %550 = shalt.err (!%p547_p9)
}
  0x18   :  { %39 = dma.hbm_to_vmem [thread:$0]  %s832_s3, 4352, %s34_s23, [#allocation6], %s578_s18, %s578_s18, %s579_s19  }
  0x19   :  { %571 = dma.done.wait [#allocation3], 4352  }
  0x1a   :  { %572 = vsyncadd [#allocation3], 4294962944 }
  0x1b   :  { %573 = dma.done.wait [#allocation6], 4352  }
  0x1c   :  { %574 = vsyncadd [#allocation6], 4294962944  ;;  %v46_v0 = vld [vmem:[%s830_s1] sm:$0xff]  ;;  %v47_v3 = vld [vmem:[%s830_s1 + $0x8] sm:$0xff]  ;;  %s581_s5 = smov [#allocation7]  }
  0x1d   :  { %v80_v1 = vld [vmem:[#allocation2] sm:$0xff]  ;;  %v81_v4 = vld [vmem:[#allocation2 + $0x8] sm:$0xff]  ;;  %v48_v6 = vld [vmem:[%s830_s1 + $0x10] sm:$0xff]  ;;  %s425_s3 = sshll.u32 %s581_s5, 4  ;;  %s426_s3 = int_to_ptr.vmem [resolvable:$true] %s425_s3 }
  0x1e   :  { %v114_v2 = vsub.f32 %v46_v0, %v80_v1  ;;  %v115_v5 = vsub.f32 %v47_v3, %v81_v4  ;;  %v82_v8 = vld [vmem:[#allocation2 + $0x10] sm:$0xff]  ;;  %v49_v11 = vld [vmem:[%s830_s1 + $0x18] sm:$0xff]  ;;  %v50_v15 = vld [vmem:[%s830_s1 + $0x20] sm:$0xff]  ;;  %p556_p11 = scmp.lt.s32.totalorder %s426_s3, %s426_s3 }
  0x1f   :  { %v116_v10 = vsub.f32 %v48_v6, %v82_v8  ;;  %v83_v12 = vld [vmem:[#allocation2 + $0x18] sm:$0xff]  ;;  %v84_v16 = vld [vmem:[#allocation2 + $0x20] sm:$0xff]  ;;  %v51_v20 = vld [vmem:[%s830_s1 + $0x28] sm:$0xff] }
  0x20   :  { %v216_v7 = vmul.f32 %v114_v2, %v114_v2  ;;  %v217_v9 = vmul.f32 %v115_v5, %v115_v5  ;;  %v117_v14 = vsub.f32 %v49_v11, %v83_v12  ;;  %v118_v19 = vsub.f32 %v50_v15, %v84_v16  ;;  %v85_v22 = vld [vmem:[#allocation2 + $0x28] sm:$0xff]  ;;  %v52_v26 = vld [vmem:[%s830_s1 + $0x30] sm:$0xff]  ;;  %v53_v30 = vld [vmem:[%s830_s1 + $0x38] sm:$0xff] }
  0x21   :  { %v218_v18 = vmul.f32 %v116_v10, %v116_v10  ;;  %v119_v25 = vsub.f32 %v51_v20, %v85_v22  ;;  %v86_v27 = vld [vmem:[#allocation2 + $0x30] sm:$0xff]  ;;  %v87_v31 = vld [vmem:[#allocation2 + $0x38] sm:$0xff]  ;;  %v54_v35 = vld [vmem:[%s830_s1 + $0x40] sm:$0xff] }
  0x22   :  { %v250_v13 = vadd.f32 0.1, %v216_v7  ;;  %v251_v17 = vadd.f32 0.1, %v217_v9  ;;  %v219_v21 = vmul.f32 %v117_v14, %v117_v14  ;;  %v220_v24 = vmul.f32 %v118_v19, %v118_v19  ;;  %v88_v37 = vld [vmem:[#allocation2 + $0x40] sm:$0xff]  ;;  %v55_v41 = vld [vmem:[%s830_s1 + $0x48] sm:$0xff] }
  0x23   :  { %v252_v23 = vadd.f32 0.1, %v218_v18  ;;  %v120_v29 = vsub.f32 %v52_v26, %v86_v27  ;;  %v221_v33 = vmul.f32 %v119_v25, %v119_v25  ;;  %v121_v34 = vsub.f32 %v53_v30, %v87_v31  ;;  %v89_v42 = vld [vmem:[#allocation2 + $0x48] sm:$0xff]  ;;  %v56_v45 = vld [vmem:[%s830_s1 + $0x50] sm:$0xff]  ;;  %v57_v50 = vld [vmem:[%s830_s1 + $0x58] sm:$0xff] }
  0x24   :  { %443 = vrcp.f32 %v250_v13  ;;  %v253_v28 = vadd.f32 0.1, %v219_v21  ;;  %v254_v32 = vadd.f32 0.1, %v220_v24  ;;  %v122_v40 = vsub.f32 %v54_v35, %v88_v37  ;;  %v90_v46 = vld [vmem:[#allocation2 + $0x50] sm:$0xff]  ;;  %v91_v52 = vld [vmem:[#allocation2 + $0x58] sm:$0xff] }
  0x25   :  { %445 = vrcp.f32 %v251_v17  ;;  %v222_v36 = vmul.f32 %v120_v29, %v120_v29  ;;  %v255_v38 = vadd.f32 0.1, %v221_v33  ;;  %v223_v39 = vmul.f32 %v121_v34, %v121_v34  ;;  %v58_v56 = vld [vmem:[%s830_s1 + $0x60] sm:$0xff]  ;;  %v59_v60 = vld [vmem:[%s830_s1 + $0x68] sm:$0xff]  ;;  %v60_v2 = vld [vmem:[%s830_s1 + $0x70] sm:$0xff] }
  0x26   :  { %447 = vrcp.f32 %v252_v23  ;;  %v123_v44 = vsub.f32 %v55_v41, %v89_v42  ;;  %v224_v48 = vmul.f32 %v122_v40, %v122_v40  ;;  %v124_v49 = vsub.f32 %v56_v45, %v90_v46  ;;  %v92_v57 = vld [vmem:[#allocation2 + $0x60] sm:$0xff]  ;;  %v93_v61 = vld [vmem:[#allocation2 + $0x68] sm:$0xff]  ;;  %v148_v3 = vld [vmem:[#allocation5] sm:$0xff] }
  0x27   :  { %449 = vrcp.f32 %v253_v28  ;;  %v256_v43 = vadd.f32 0.1, %v222_v36  ;;  %v257_v47 = vadd.f32 0.1, %v223_v39  ;;  %v125_v55 = vsub.f32 %v57_v50, %v91_v52  ;;  %v182_v62 = vld [vmem:[%s829_s0] sm:$0xff]  ;;  %v183_v4 = vld [vmem:[%s829_s0 + $0x8] sm:$0xff] }
  0x28   :  { %451 = vrcp.f32 %v254_v32  ;;  %v225_v51 = vmul.f32 %v123_v44, %v123_v44  ;;  %v258_v53 = vadd.f32 0.1, %v224_v48  ;;  %v226_v54 = vmul.f32 %v124_v49, %v124_v49  ;;  %v94_v6 = vld [vmem:[#allocation2 + $0x70] sm:$0xff]  ;;  %v149_v8 = vld [vmem:[#allocation5 + $0x8] sm:$0xff]  ;;  %v62_v19 = vld [vmem:[%s830_s1 + $0x80] sm:$0xff] }
  0x29   :  { %453 = vrcp.f32 %v255_v38  ;;  %v126_v59 = vsub.f32 %v58_v56, %v92_v57  ;;  %v227_v0 = vmul.f32 %v125_v55, %v125_v55  ;;  %v127_v1 = vsub.f32 %v59_v60, %v93_v61  ;;  %v61_v12 = vld [vmem:[%s830_s1 + $0x78] sm:$0xff]  ;;  %v184_v16 = vld [vmem:[%s829_s0 + $0x10] sm:$0xff]  ;;  %v96_v20 = vld [vmem:[#allocation2 + $0x80] sm:$0xff] }
  0x2a   :  { %455 = vrcp.f32 %v256_v43  ;;  %v259_v58 = vadd.f32 0.1, %v225_v51  ;;  %v260_v63 = vadd.f32 0.1, %v226_v54  ;;  %v128_v11 = vsub.f32 %v60_v2, %v94_v6  ;;  %v95_v13 = vld [vmem:[#allocation2 + $0x78] sm:$0xff]  ;;  %v150_v22 = vld [vmem:[#allocation5 + $0x10] sm:$0xff] }
  0x2b   :  { %457 = vrcp.f32 %v257_v47  ;;  %v228_v5 = vmul.f32 %v126_v59, %v126_v59  ;;  %v261_v9 = vadd.f32 0.1, %v227_v0  ;;  %v229_v10 = vmul.f32 %v127_v1, %v127_v1  ;;  %v185_v23 = vld [vmem:[%s829_s0 + $0x18] sm:$0xff]  ;;  %v63_v26 = vld [vmem:[%s830_s1 + $0x88] sm:$0xff]  ;;  %v186_v30 = vld [vmem:[%s829_s0 + $0x20] sm:$0xff] }
  0x2c   :  { %459 = vrcp.f32 %v258_v53  ;;  %v129_v18 = vsub.f32 %v61_v12, %v95_v13  ;;  %v230_v25 = vmul.f32 %v128_v11, %v128_v11  ;;  %v151_v29 = vld [vmem:[#allocation5 + $0x18] sm:$0xff]  ;;  %v130_v32 = vsub.f32 %v62_v19, %v96_v20  ;;  %v152_v37 = vld [vmem:[#allocation5 + $0x20] sm:$0xff]  ;;  %v65_v47 = vld [vmem:[%s830_s1 + $0x98] sm:$0xff] }
  0x2d   :  { %461 = vrcp.f32 %v259_v58  ;;  %v262_v17 = vadd.f32 0.1, %v228_v5  ;;  %v263_v24 = vadd.f32 0.1, %v229_v10  ;;  %v97_v33 = vld [vmem:[#allocation2 + $0x88] sm:$0xff]  ;;  %v64_v39 = vld [vmem:[%s830_s1 + $0x90] sm:$0xff] }
  0x2e   :  { %463 = vrcp.f32 %v260_v63  ;;  %v231_v31 = vmul.f32 %v129_v18, %v129_v18  ;;  %v264_v38 = vadd.f32 0.1, %v230_v25  ;;  %v98_v40 = vld [vmem:[#allocation2 + $0x90] sm:$0xff]  ;;  %v187_v43 = vld [vmem:[%s829_s0 + $0x28] sm:$0xff]  ;;  %v232_v45 = vmul.f32 %v130_v32, %v130_v32  ;;  %v99_v48 = vld [vmem:[#allocation2 + $0x98] sm:$0xff] }
  0x2f   :  { %465 = vrcp.f32 %v261_v9  ;;  %v131_v46 = vsub.f32 %v63_v26, %v97_v33  ;;  %v188_v51 = vld [vmem:[%s829_s0 + $0x30] sm:$0xff]  ;;  %v132_v52 = vsub.f32 %v64_v39, %v98_v40  ;;  %v66_v53 = vld [vmem:[%s830_s1 + $0xa0] sm:$0xff]  ;;  %v153_v56 = vld [vmem:[#allocation5 + $0x28] sm:$0xff]  ;;  %v133_v2 = vsub.f32 %v65_v47, %v99_v48 }
  0x30   :  { %467 = vrcp.f32 %v262_v17  ;;  %v265_v44 = vadd.f32 0.1, %v231_v31  ;;  %v189_v57 = vld [vmem:[%s829_s0 + $0x38] sm:$0xff]  ;;  %v266_v58 = vadd.f32 0.1, %v232_v45  ;;  %v100_v60 = vld [vmem:[#allocation2 + $0xa0] sm:$0xff] }
  0x31   :  { %v444_v7 = vpop.eup %443  ;;  %469 = vrcp.f32 %v263_v24  ;;  %v233_v59 = vmul.f32 %v131_v46, %v131_v46  ;;  %v154_v0 = vld [vmem:[#allocation5 + $0x30] sm:$0xff]  ;;  %v234_v1 = vmul.f32 %v132_v52, %v132_v52  ;;  %v134_v11 = vsub.f32 %v66_v53, %v100_v60  ;;  %v68_v17 = vld [vmem:[%s830_s1 + $0xb0] sm:$0xff]  ;;  %v69_v24 = vld [vmem:[%s830_s1 + $0xb8] sm:$0xff] }
  0x32   :  { %v446_v14 = vpop.eup %445  ;;  %v318_v15 = vmul.f32 %v444_v7, %v182_v62  ;;  %471 = vrcp.f32 %v264_v38  ;;  %v155_v7 = vld [vmem:[#allocation5 + $0x38] sm:$0xff]  ;;  %v190_v9 = vld [vmem:[%s829_s0 + $0x40] sm:$0xff]  ;;  %v102_v18 = vld [vmem:[#allocation2 + $0xb0] sm:$0xff] }
  0x33   :  { %v319_v21 = vmul.f32 %v446_v14, %v183_v4  ;;  %v448_v27 = vpop.eup %447  ;;  %473 = vrcp.f32 %v265_v44  ;;  %v101_v4 = vld [vmem:[#allocation2 + $0xa8] sm:$0xff]  ;;  %v267_v10 = vadd.f32 0.1, %v233_v59  ;;  %v103_v25 = vld [vmem:[#allocation2 + $0xb8] sm:$0xff]  ;;  %v70_v38 = vld [vmem:[%s830_s1 + $0xc0] sm:$0xff] }
  0x34   :  { %v352_v28 = vadd.f32 %v318_v15, %v148_v3  ;;  %v450_v34 = vpop.eup %449  ;;  %v320_v36 = vmul.f32 %v448_v27, %v184_v16  ;;  %v67_v3 = vld [vmem:[%s830_s1 + $0xa8] sm:$0xff]  ;;  %475 = vrcp.f32 %v266_v58  ;;  %v268_v15 = vadd.f32 0.1, %v234_v1  ;;  %v104_v39 = vld [vmem:[#allocation2 + $0xc0] sm:$0xff]  ;;  %v72_v59 = vld [vmem:[%s830_s1 + $0xd0] sm:$0xff] }
  0x35   :  { %v353_v35 = vadd.f32 %v319_v21, %v149_v8  ;;  %v452_v41 = vpop.eup %451  ;;  %v321_v42 = vmul.f32 %v450_v34, %v185_v23  ;;  %v156_v8 = vld [vmem:[#allocation5 + $0x40] sm:$0xff]  ;;  %v191_v14 = vld [vmem:[%s829_s0 + $0x48] sm:$0xff]  ;;  %v235_v16 = vmul.f32 %v133_v2, %v133_v2  ;;  %477 = vrcp.f32 %v267_v10  ;;  %v193_v34 = vld [vmem:[%s829_s0 + $0x58] sm:$0xff] }
  0x36   :  { %386 = vst [vmem:[#allocation7] sm:$0xff] %v352_v28  ;;  %v354_v49 = vadd.f32 %v320_v36, %v150_v22  ;;  %v322_v50 = vmul.f32 %v452_v41, %v186_v30  ;;  %v454_v54 = vpop.eup %453  ;;  %v192_v21 = vld [vmem:[%s829_s0 + $0x50] sm:$0xff]  ;;  %v236_v22 = vmul.f32 %v134_v11, %v134_v11  ;;  %v135_v23 = vsub.f32 %v67_v3, %v101_v4  ;;  %v158_v30 = vld [vmem:[#allocation5 + $0x50] sm:$0xff]  ;;  %v71_v44 = vld [vmem:[%s830_s1 + $0xc8] sm:$0xff] }
  0x37   :  { %387 = vst [vmem:[#allocation7 + $0x8] sm:$0xff] %v353_v35  ;;  %v355_v55 = vadd.f32 %v321_v42, %v151_v29  ;;  %v456_v61 = vpop.eup %455  ;;  %v323_v63 = vmul.f32 %v454_v54, %v187_v43  ;;  %v157_v29 = vld [vmem:[#allocation5 + $0x48] sm:$0xff]  ;;  %479 = vrcp.f32 %v268_v15  ;;  %v269_v31 = vadd.f32 0.1, %v235_v16  ;;  %v194_v42 = vld [vmem:[%s829_s0 + $0x60] sm:$0xff]  ;;  %v105_v45 = vld [vmem:[#allocation2 + $0xc8] sm:$0xff] }
  0x38   :  { %388 = vst [vmem:[#allocation7 + $0x10] sm:$0xff] %v354_v49  ;;  %v356_v62 = vadd.f32 %v322_v50, %v152_v37  ;;  %v458_v5 = vpop.eup %457  ;;  %v324_v6 = vmul.f32 %v456_v61, %v188_v51  ;;  %v270_v35 = vadd.f32 0.1, %v236_v22  ;;  %v237_v36 = vmul.f32 %v135_v23, %v135_v23  ;;  %v159_v48 = vld [vmem:[#allocation5 + $0x58] sm:$0xff]  ;;  %v160_v49 = vld [vmem:[#allocation5 + $0x60] sm:$0xff]  ;;  %v197_v1 = vld [vmem:[%s829_s0 + $0x78] sm:$0xff] }
  0x39   :  { %389 = vst [vmem:[#allocation7 + $0x18] sm:$0xff] %v355_v55  ;;  %v357_v12 = vadd.f32 %v323_v63, %v153_v56  ;;  %v325_v13 = vmul.f32 %v458_v5, %v189_v57  ;;  %v460_v19 = vpop.eup %459  ;;  %v136_v37 = vsub.f32 %v68_v17, %v102_v18  ;;  %481 = vrcp.f32 %v269_v31  ;;  %v195_v50 = vld [vmem:[%s829_s0 + $0x68] sm:$0xff]  ;;  %v161_v56 = vld [vmem:[#allocation5 + $0x68] sm:$0xff]  ;;  %v106_v60 = vld [vmem:[#allocation2 + $0xd0] sm:$0xff] }
  0x3a   :  { %390 = vst [vmem:[#allocation7 + $0x20] sm:$0xff] %v356_v62  ;;  %v358_v20 = vadd.f32 %v324_v6, %v154_v0  ;;  %v462_v26 = vpop.eup %461  ;;  %v326_v28 = vmul.f32 %v460_v19, %v190_v9  ;;  %v137_v43 = vsub.f32 %v69_v24, %v103_v25  ;;  %483 = vrcp.f32 %v270_v35  ;;  %v162_v63 = vld [vmem:[#allocation5 + $0x70] sm:$0xff]  ;;  %v196_v0 = vld [vmem:[%s829_s0 + $0x70] sm:$0xff]  ;;  %v107_v9 = vld [vmem:[#allocation2 + $0xd8] sm:$0xff] }
  0x3b   :  { %391 = vst [vmem:[#allocation7 + $0x28] sm:$0xff] %v357_v12  ;;  %v359_v27 = vadd.f32 %v325_v13, %v155_v7  ;;  %v464_v32 = vpop.eup %463  ;;  %v327_v33 = vmul.f32 %v462_v26, %v191_v14  ;;  %v271_v51 = vadd.f32 0.1, %v237_v36  ;;  %v238_v52 = vmul.f32 %v136_v37, %v136_v37  ;;  %v74_v10 = vld [vmem:[%s830_s1 + $0xe0] sm:$0xff]  ;;  %v75_v16 = vld [vmem:[%s830_s1 + $0xe8] sm:$0xff]  ;;  %v164_v25 = vld [vmem:[#allocation5 + $0x80] sm:$0xff] }
  0x3c   :  { %392 = vst [vmem:[#allocation7 + $0x30] sm:$0xff] %v358_v20  ;;  %v360_v40 = vadd.f32 %v326_v28, %v156_v8  ;;  %v328_v41 = vmul.f32 %v464_v32, %v192_v21  ;;  %v466_v46 = vpop.eup %465  ;;  %v239_v57 = vmul.f32 %v137_v43, %v137_v43  ;;  %v138_v58 = vsub.f32 %v70_v38, %v104_v39  ;;  %v73_v8 = vld [vmem:[%s830_s1 + $0xd8] sm:$0xff]  ;;  %v108_v15 = vld [vmem:[#allocation2 + $0xe0] sm:$0xff]  ;;  %v109_v17 = vld [vmem:[#allocation2 + $0xe8] sm:$0xff] }
  0x3d   :  { %393 = vst [vmem:[#allocation7 + $0x38] sm:$0xff] %v359_v27  ;;  %v361_v47 = vadd.f32 %v327_v33, %v157_v29  ;;  %v468_v53 = vpop.eup %467  ;;  %v329_v55 = vmul.f32 %v466_v46, %v193_v34  ;;  %485 = vrcp.f32 %v271_v51  ;;  %v272_v2 = vadd.f32 0.1, %v238_v52  ;;  %v163_v21 = vld [vmem:[#allocation5 + $0x78] sm:$0xff]  ;;  %v198_v22 = vld [vmem:[%s829_s0 + $0x80] sm:$0xff]  ;;  %v76_v29 = vld [vmem:[%s830_s1 + $0xf0] sm:$0xff] }
  0x3e   :  { %394 = vst [vmem:[#allocation7 + $0x40] sm:$0xff] %v360_v40  ;;  %v362_v54 = vadd.f32 %v328_v41, %v158_v30  ;;  %v470_v61 = vpop.eup %469  ;;  %v330_v62 = vmul.f32 %v468_v53, %v194_v42  ;;  %v139_v3 = vsub.f32 %v71_v44, %v105_v45  ;;  %v273_v6 = vadd.f32 0.1, %v239_v57  ;;  %v110_v30 = vld [vmem:[#allocation2 + $0xf0] sm:$0xff]  ;;  %v199_v33 = vld [vmem:[%s829_s0 + $0x88] sm:$0xff]  ;;  %v77_v36 = vld [vmem:[%s830_s1 + $0xf8] sm:$0xff] }
  0x3f   :  { %395 = vst [vmem:[#allocation7 + $0x48] sm:$0xff] %v361_v47  ;;  %v363_v4 = vadd.f32 %v329_v55, %v159_v48  ;;  %v331_v5 = vmul.f32 %v470_v61, %v195_v50  ;;  %v240_v7 = vmul.f32 %v138_v58, %v138_v58  ;;  %v472_v11 = vpop.eup %471  ;;  %487 = vrcp.f32 %v272_v2  ;;  %v111_v37 = vld [vmem:[#allocation2 + $0xf8] sm:$0xff]  ;;  %v166_v41 = vld [vmem:[#allocation5 + $0x90] sm:$0xff]  ;;  %v200_v42 = vld [vmem:[%s829_s0 + $0x90] sm:$0xff] }
  0x40   :  { %396 = vst [vmem:[#allocation7 + $0x50] sm:$0xff] %v362_v54  ;;  %v364_v12 = vadd.f32 %v330_v62, %v160_v49  ;;  %v241_v13 = vmul.f32 %v139_v3, %v139_v3  ;;  %v140_v14 = vsub.f32 %v72_v59, %v106_v60  ;;  %v474_v18 = vpop.eup %473  ;;  %v332_v20 = vmul.f32 %v472_v11, %v196_v0  ;;  %v165_v40 = vld [vmem:[#allocation5 + $0x88] sm:$0xff]  ;;  %v78_v50 = vld [vmem:[%s830_s1 + $0x100] sm:$0xff]  ;;  %v79_v57 = vld [vmem:[%s830_s1 + $0x108] sm:$0xff] }
  0x41   :  { %397 = vst [vmem:[#allocation7 + $0x58] sm:$0xff] %v363_v4  ;;  %v365_v19 = vadd.f32 %v331_v5, %v161_v56  ;;  %489 = vrcp.f32 %v273_v6  ;;  %v274_v23 = vadd.f32 0.1, %v240_v7  ;;  %v333_v24 = vmul.f32 %v474_v18, %v197_v1  ;;  %v476_v31 = vpop.eup %475  ;;  %v201_v45 = vld [vmem:[%s829_s0 + $0x98] sm:$0xff]  ;;  %v112_v51 = vld [vmem:[#allocation2 + $0x100] sm:$0xff]  ;;  %v113_v58 = vld [vmem:[#allocation2 + $0x108] sm:$0xff] }
  0x42   :  { %398 = vst [vmem:[#allocation7 + $0x60] sm:$0xff] %v364_v12  ;;  %v275_v26 = vadd.f32 0.1, %v241_v13  ;;  %v242_v27 = vmul.f32 %v140_v14, %v140_v14  ;;  %v141_v28 = vsub.f32 %v73_v8, %v107_v9  ;;  %v366_v32 = vadd.f32 %v332_v20, %v162_v63  ;;  %v478_v44 = vpop.eup %477  ;;  %v202_v55 = vld [vmem:[%s829_s0 + $0xa0] sm:$0xff]  ;;  %v167_v1 = vld [vmem:[#allocation5 + $0x98] sm:$0xff]  ;;  %v168_v8 = vld [vmem:[#allocation5 + $0xa0] sm:$0xff] }
  0x43   :  { %399 = vst [vmem:[#allocation7 + $0x68] sm:$0xff] %v365_v19  ;;  %491 = vrcp.f32 %v274_v23  ;;  %v142_v34 = vsub.f32 %v74_v10, %v108_v15  ;;  %v143_v35 = vsub.f32 %v75_v16, %v109_v17  ;;  %v367_v38 = vadd.f32 %v333_v24, %v163_v21  ;;  %v203_v9 = vld [vmem:[%s829_s0 + $0xa8] sm:$0xff]  ;;  %v169_v16 = vld [vmem:[#allocation5 + $0xa8] sm:$0xff]  ;;  %v204_v17 = vld [vmem:[%s829_s0 + $0xb0] sm:$0xff] }
  0x44   :  { %v334_v39 = vmul.f32 %v476_v31, %v198_v22  ;;  %493 = vrcp.f32 %v275_v26  ;;  %v276_v43 = vadd.f32 0.1, %v242_v27  ;;  %400 = vst [vmem:[#allocation7 + $0x70] sm:$0xff] %v366_v32  ;;  %v243_v46 = vmul.f32 %v141_v28, %v141_v28  ;;  %v480_v52 = vpop.eup %479  ;;  %v205_v22 = vld [vmem:[%s829_s0 + $0xb8] sm:$0xff]  ;;  %v170_v24 = vld [vmem:[#allocation5 + $0xb0] sm:$0xff] }
  0x45   :  { %v244_v47 = vmul.f32 %v142_v34, %v142_v34  ;;  %v245_v48 = vmul.f32 %v143_v35, %v143_v35  ;;  %v144_v49 = vsub.f32 %v76_v29, %v110_v30  ;;  %401 = vst [vmem:[#allocation7 + $0x78] sm:$0xff] %v367_v38  ;;  %v335_v54 = vmul.f32 %v478_v44, %v199_v33  ;;  %v171_v30 = vld [vmem:[#allocation5 + $0xb8] sm:$0xff]  ;;  %v206_v31 = vld [vmem:[%s829_s0 + $0xc0] sm:$0xff] }
  0x46   :  { %v368_v53 = vadd.f32 %v334_v39, %v164_v25  ;;  %495 = vrcp.f32 %v276_v43  ;;  %v145_v56 = vsub.f32 %v77_v36, %v111_v37  ;;  %v336_v59 = vmul.f32 %v480_v52, %v200_v42  ;;  %v482_v63 = vpop.eup %481  ;;  %v207_v33 = vld [vmem:[%s829_s0 + $0xc8] sm:$0xff]  ;;  %v172_v36 = vld [vmem:[#allocation5 + $0xc0] sm:$0xff] }
  0x47   :  { %v277_v60 = vadd.f32 0.1, %v243_v46  ;;  %v278_v61 = vadd.f32 0.1, %v244_v47  ;;  %v279_v62 = vadd.f32 0.1, %v245_v48  ;;  %v369_v0 = vadd.f32 %v335_v54, %v165_v40  ;;  %v484_v5 = vpop.eup %483 }
  0x48   :  { %402 = vst [vmem:[#allocation7 + $0x80] sm:$0xff] %v368_v53  ;;  %v246_v2 = vmul.f32 %v144_v49, %v144_v49  ;;  %v247_v3 = vmul.f32 %v145_v56, %v145_v56  ;;  %v146_v4 = vsub.f32 %v78_v50, %v112_v51  ;;  %v370_v6 = vadd.f32 %v336_v59, %v166_v41  ;;  %v173_v40 = vld [vmem:[#allocation5 + $0xc8] sm:$0xff]  ;;  %v208_v41 = vld [vmem:[%s829_s0 + $0xd0] sm:$0xff]  ;;  %v210_v49 = vld [vmem:[%s829_s0 + $0xe0] sm:$0xff] }
  0x49   :  { %v337_v7 = vmul.f32 %v482_v63, %v201_v45  ;;  %497 = vrcp.f32 %v277_v60  ;;  %v147_v10 = vsub.f32 %v79_v57, %v113_v58  ;;  %403 = vst [vmem:[#allocation7 + $0x88] sm:$0xff] %v369_v0  ;;  %v338_v11 = vmul.f32 %v484_v5, %v202_v55  ;;  %v174_v45 = vld [vmem:[#allocation5 + $0xd0] sm:$0xff]  ;;  %v209_v48 = vld [vmem:[%s829_s0 + $0xd8] sm:$0xff]  ;;  %v175_v52 = vld [vmem:[#allocation5 + $0xd8] sm:$0xff] }
  0x4a   :  { %499 = vrcp.f32 %v278_v61  ;;  %v280_v12 = vadd.f32 0.1, %v246_v2  ;;  %v281_v13 = vadd.f32 0.1, %v247_v3  ;;  %v486_v14 = vpop.eup %485  ;;  %404 = vst [vmem:[#allocation7 + $0x90] sm:$0xff] %v370_v6  ;;  %v248_v18 = vmul.f32 %v146_v4, %v146_v4  ;;  %v211_v53 = vld [vmem:[%s829_s0 + $0xe8] sm:$0xff] }
  0x4b   :  { %v371_v15 = vadd.f32 %v337_v7, %v167_v1  ;;  %501 = vrcp.f32 %v279_v62  ;;  %v249_v19 = vmul.f32 %v147_v10, %v147_v10  ;;  %v372_v20 = vadd.f32 %v338_v11, %v168_v8  ;;  %v176_v56 = vld [vmem:[#allocation5 + $0xe0] sm:$0xff]  ;;  %v177_v60 = vld [vmem:[#allocation5 + $0xe8] sm:$0xff]  ;;  %v178_v1 = vld [vmem:[#allocation5 + $0xf0] sm:$0xff] }
  0x4c   :  { %v339_v21 = vmul.f32 %v486_v14, %v203_v9  ;;  %503 = vrcp.f32 %v280_v12  ;;  %v488_v23 = vpop.eup %487  ;;  %v282_v25 = vadd.f32 0.1, %v248_v18  ;;  %v212_v57 = vld [vmem:[%s829_s0 + $0xf0] sm:$0xff]  ;;  %v213_v61 = vld [vmem:[%s829_s0 + $0xf8] sm:$0xff]  ;;  %v179_v5 = vld [vmem:[#allocation5 + $0xf8] sm:$0xff] }
  0x4d   :  { %405 = vst [vmem:[#allocation7 + $0x98] sm:$0xff] %v371_v15  ;;  %505 = vrcp.f32 %v281_v13  ;;  %v283_v26 = vadd.f32 0.1, %v249_v19  ;;  %406 = vst [vmem:[#allocation7 + $0xa0] sm:$0xff] %v372_v20  ;;  %v340_v29 = vmul.f32 %v488_v23, %v204_v17  ;;  %v214_v6 = vld [vmem:[%s829_s0 + $0x100] sm:$0xff]  ;;  %v215_v9 = vld [vmem:[%s829_s0 + $0x108] sm:$0xff] }
  0x4e   :  { %v490_v27 = vpop.eup %489  ;;  %v373_v28 = vadd.f32 %v339_v21, %v169_v16  ;;  %507 = vrcp.f32 %v282_v25  ;;  %v180_v12 = vld [vmem:[#allocation5 + $0x100] sm:$0xff]  ;;  %v181_v16 = vld [vmem:[#allocation5 + $0x108] sm:$0xff]  ;;  %s551_s0 = scalar_lea.vmem %s426_s3, 4352 }
  0x4f   :  { %v341_v32 = vmul.f32 %v490_v27, %v205_v22  ;;  %v374_v35 = vadd.f32 %v340_v29, %v170_v24  ;;  %509 = vrcp.f32 %v283_v26  ;;  %p552_p10 = scmp.ne.s32.totalorder %s426_s3, %s551_s0  ;;  %p557_p12 = scmp.lt.s32.totalorder %s551_s0, %s551_s0 }
  0x50   :  { %v492_v34 = vpop.eup %491  ;;  %407 = vst [vmem:[#allocation7 + $0xa8] sm:$0xff] %v373_v28 }
  0x51   :  { %v494_v37 = vpop.eup %493  ;;  %v375_v38 = vadd.f32 %v341_v32, %v171_v30  ;;  %v342_v39 = vmul.f32 %v492_v34, %v206_v31  ;;  %408 = vst [vmem:[#allocation7 + $0xb0] sm:$0xff] %v374_v35  ;;  %p558_p13 = por %p557_p12, %p556_p11 }
  0x52   :  { %v343_v42 = vmul.f32 %v494_v37, %v207_v33 }
  0x53   :  { %v496_v43 = vpop.eup %495  ;;  %409 = vst [vmem:[#allocation7 + $0xb8] sm:$0xff] %v375_v38  ;;  %v376_v44 = vadd.f32 %v342_v39, %v172_v36  ;;  %p559_p0 = pnand %p558_p13, %p552_p10 }
  0x54   :  { %v377_v46 = vadd.f32 %v343_v42, %v173_v40  ;;  %v344_v47 = vmul.f32 %v496_v43, %v208_v41 }
  0x55   :  { %410 = vst [vmem:[#allocation7 + $0xc0] sm:$0xff] %v376_v44 }
  0x56   :  { %v498_v50 = vpop.eup %497  ;;  %411 = vst [vmem:[#allocation7 + $0xc8] sm:$0xff] %v377_v46  ;;  %v378_v51 = vadd.f32 %v344_v47, %v174_v45 }
  0x57   :  { %v500_v54 = vpop.eup %499  ;;  %v345_v55 = vmul.f32 %v498_v50, %v209_v48 }
  0x58   :  { %v502_v58 = vpop.eup %501  ;;  %412 = vst [vmem:[#allocation7 + $0xd0] sm:$0xff] %v378_v51  ;;  %v346_v59 = vmul.f32 %v500_v54, %v210_v49 }
  0x59   :  { %v504_v62 = vpop.eup %503  ;;  %v379_v63 = vadd.f32 %v345_v55, %v175_v52  ;;  %v347_v0 = vmul.f32 %v502_v58, %v211_v53 }
  0x5a   :  { %v506_v2 = vpop.eup %505  ;;  %v380_v3 = vadd.f32 %v346_v59, %v176_v56  ;;  %v348_v4 = vmul.f32 %v504_v62, %v212_v57 }
  0x5b   :  { %413 = vst [vmem:[#allocation7 + $0xd8] sm:$0xff] %v379_v63  ;;  %v381_v7 = vadd.f32 %v347_v0, %v177_v60  ;;  %v349_v8 = vmul.f32 %v506_v2, %v213_v61  ;;  %v508_v10 = vpop.eup %507 }
  0x5c   :  { %414 = vst [vmem:[#allocation7 + $0xe0] sm:$0xff] %v380_v3  ;;  %v382_v11 = vadd.f32 %v348_v4, %v178_v1  ;;  %v510_v13 = vpop.eup %509  ;;  %v350_v15 = vmul.f32 %v508_v10, %v214_v6 }
  0x5d   :  { %415 = vst [vmem:[#allocation7 + $0xe8] sm:$0xff] %v381_v7  ;;  %v383_v14 = vadd.f32 %v349_v8, %v179_v5  ;;  %v351_v17 = vmul.f32 %v510_v13, %v215_v9 }
  0x5e   :  { %416 = vst [vmem:[#allocation7 + $0xf0] sm:$0xff] %v382_v11  ;;  %v384_v18 = vadd.f32 %v350_v15, %v180_v12 }
  0x5f   :  { %417 = vst [vmem:[#allocation7 + $0xf8] sm:$0xff] %v383_v14  ;;  %v385_v19 = vadd.f32 %v351_v17, %v181_v16 }
  0x60   :  { %418 = vst [vmem:[#allocation7 + $0x100] sm:$0xff] %v384_v18 }
  0x61   :  { %419 = vst [vmem:[#allocation7 + $0x108] sm:$0xff] %v385_v19 }
  0x62   :  { %562 = shalt.err (!%p559_p0)
}
  0x63   :  { %431 = dma.vmem_to_hbm [thread:$0]  %s426_s3, 4352, %s833_s4, [#allocation4], %s578_s18, %s578_s18, %s579_s19  }
  0x64   :  { %575 = dma.done.wait [#allocation4], 4352  }
  0x65   :  { %576 = vsyncadd [#allocation4], 4294962944 }
  0x66   :  { %435 = vsyncpa [#allocation3], 1 }
  0x67   :  { %436 = vsyncpa [#allocation6], 1 }
  0x68   :  { %437 = vsyncpa [#allocation4], 1 }

</bundles_post_ra>
